<compile_context>
chip_gen: v6e
topology: v6e:2x2x1
jax: 0.10.0
libtpu: 0.0.40
codegen_flags: <defaults>
</compile_context>

<pallas_src>
import jax
import jax.numpy as jnp
from jax.experimental import pallas as pl
from jax.experimental.pallas import tpu as pltpu


# ---------------------------------------------------------------------------
# Kernels
# ---------------------------------------------------------------------------

def _cos_loss_kernel_single(pred_ref, targ_ref, out_ref):
    """Whole feature dim in one block: single pass, no scratch."""
    p = pred_ref[...].astype(jnp.float32)
    t = targ_ref[...].astype(jnp.float32)
    dot = jnp.sum(p * t, axis=-1, keepdims=True)
    pp = jnp.sum(p * p, axis=-1, keepdims=True)
    tt = jnp.sum(t * t, axis=-1, keepdims=True)
    norm_p = jnp.sqrt(pp + 1e-8)
    norm_t = jnp.sqrt(tt + 1e-8)
    cos = dot / (norm_p * norm_t + 1e-8)
    out_ref[...] = (1.0 - cos).astype(out_ref.dtype)


def _cos_loss_kernel_d_tiled(pred_ref, targ_ref, out_ref, dot_acc, pp_acc, tt_acc):
    """Feature dim tiled (huge D): lane-dense f32 accumulators, reduce at end."""
    j = pl.program_id(1)  # reduction over feature tiles — last grid axis

    @pl.when(j == 0)
    def _():
        dot_acc[...] = jnp.zeros_like(dot_acc)
        pp_acc[...] = jnp.zeros_like(pp_acc)
        tt_acc[...] = jnp.zeros_like(tt_acc)

    n_chunks = pred_ref.shape[1] // 128  # tile_d is a multiple of 128 by construction
    # Per-lane partial sums (VPU adds only, static 128-lane slices). The single
    # cross-lane (XLU) reduction is deferred to the final feature step.
    for c in range(n_chunks):  # static unroll; n_chunks <= 64 by construction
        sl = slice(c * 128, (c + 1) * 128)
        p = pred_ref[:, sl].astype(jnp.float32)
        t = targ_ref[:, sl].astype(jnp.float32)
        dot_acc[...] += p * t
        pp_acc[...] += p * p
        tt_acc[...] += t * t

    @pl.when(j == pl.num_programs(1) - 1)
    def _():
        dot = jnp.sum(dot_acc[...], axis=-1, keepdims=True)
        pp = jnp.sum(pp_acc[...], axis=-1, keepdims=True)
        tt = jnp.sum(tt_acc[...], axis=-1, keepdims=True)
        norm_p = jnp.sqrt(pp + 1e-8)
        norm_t = jnp.sqrt(tt + 1e-8)
        cos = dot / (norm_p * norm_t + 1e-8)
        out_ref[...] = (1.0 - cos).astype(out_ref.dtype)


# ---------------------------------------------------------------------------
# Tiling plan
# ---------------------------------------------------------------------------

def _vmem_capacity_bytes():
    cap = 64 << 20  # assume the smallest generation (v7x per-core VMEM)
    try:
        info = pltpu.get_tpu_info()
        cap = int(getattr(info, "vmem_capacity_bytes", cap)) or cap
    except Exception:
        pass
    return cap


def _pick_tile_b(B, max_rows, min_rows):
    """Largest batch tile (multiple of min_rows) within max_rows; prefer >= 2
    tiles so the 'parallel' grid axis can shard across TensorCores (v7x)."""
    max_rows = max(min_rows, (max_rows // min_rows) * min_rows)
    cap = max_rows
    if B >= 2 * min_rows:
        half = ((B // 2) // min_rows) * min_rows
        if half >= min_rows:
            cap = min(cap, half)

    def best_divisor(n):
        t = (min(cap, n) // min_rows) * min_rows
        while t >= min_rows:
            if n % t == 0:
                return t
            t -= min_rows
        return 0

    t = best_divisor(B)
    if t:
        return t, B                        # no padding needed
    b_pad = ((B + min_rows - 1) // min_rows) * min_rows
    return best_divisor(b_pad), b_pad      # min_rows always divides b_pad


def _plan(B, D, itemsize, block_budget):
    """Choose (tile_b, tile_d, B_pad, D_pad, nb, nd); every input block is
    bounded by block_budget bytes (pipeline double-buffers: x4 total)."""
    min_rows = 8 if itemsize >= 4 else (16 if itemsize == 2 else 32)
    row_bytes = max(1, D * itemsize)

    if row_bytes * min_rows <= block_budget:
        # Common case: whole feature dim in one block.
        tile_d, d_pad, nd = D, D, 1
        max_rows = block_budget // row_bytes
    else:
        # Rare case: tile the (huge) feature dim; reduction axis last in grid.
        cap_d = min(block_budget // (itemsize * min_rows), 8192)
        cap_d = max(128, (cap_d // 128) * 128)
        tile_d = 0
        c = cap_d
        while c >= 128:                    # prefer a divisor of D (no padding)
            if D % c == 0:
                tile_d = c
                break
            c -= 128
        if tile_d == 0:
            tile_d = cap_d
        d_pad = ((D + tile_d - 1) // tile_d) * tile_d
        nd = d_pad // tile_d
        # Cap rows so the 3 lane-dense f32 accumulators stay small (<= 3 MiB).
        max_rows = min(2048, block_budget // (tile_d * itemsize))

    tile_b, b_pad = _pick_tile_b(B, max_rows, min_rows)
    return tile_b, tile_d, b_pad, d_pad, b_pad // tile_b, nd


# ---------------------------------------------------------------------------
# Wrapper
# ---------------------------------------------------------------------------

def cosine_similarity_loss(predictions, targets):
    """mean_over_rows(1 - cos_sim(pred_row, targ_row)) for (B, D) inputs."""
    assert predictions.shape == targets.shape
    if predictions.ndim != 2:
        predictions = predictions.reshape(predictions.shape[0], -1)
        targets = targets.reshape(targets.shape[0], -1)
    B, D = predictions.shape

    cap = _vmem_capacity_bytes()
    block_budget = max(2 << 20, min(8 << 20, cap // 16))        # per input block
    vmem_limit = int(min(96 << 20, max(32 << 20, (cap * 3) // 4)))

    itemsize = jnp.dtype(predictions.dtype).itemsize
    tile_b, tile_d, b_pad, d_pad, nb, nd = _plan(B, D, itemsize, block_budget)

    if b_pad != B or d_pad != D:
        # Zero padding is exact for dot / |p|^2 / |t|^2; padded rows are sliced
        # off below. Only taken for shapes with no clean tiling.
        widths = ((0, b_pad - B), (0, d_pad - D))
        predictions = jnp.pad(predictions, widths)
        targets = jnp.pad(targets, widths)

    out_shape = jax.ShapeDtypeStruct((b_pad, 1), jnp.float32)

    if nd == 1:
        losses = pl.pallas_call(
            _cos_loss_kernel_single,
            out_shape=out_shape,
            grid_spec=pltpu.PrefetchScalarGridSpec(
                num_scalar_prefetch=0,
                grid=(nb,),
                in_specs=[
                    pl.BlockSpec((tile_b, tile_d), lambda i: (i, 0)),
                    pl.BlockSpec((tile_b, tile_d), lambda i: (i, 0)),
                ],
                out_specs=pl.BlockSpec((tile_b, 1), lambda i: (i, 0)),
            ),
            compiler_params=pltpu.CompilerParams(
                dimension_semantics=("parallel",),
                vmem_limit_bytes=vmem_limit,
            ),
        )(predictions, targets)
    else:
        # TODO(synk): for tiny B with huge D, reassociate the D reduction into an
        # outer "parallel" chunk axis so v7x's second TensorCore also gets work.
        losses = pl.pallas_call(
            _cos_loss_kernel_d_tiled,
            out_shape=out_shape,
            grid_spec=pltpu.PrefetchScalarGridSpec(
                num_scalar_prefetch=0,
                grid=(nb, nd),
                in_specs=[
                    pl.BlockSpec((tile_b, tile_d), lambda i, j: (i, j)),
                    pl.BlockSpec((tile_b, tile_d), lambda i, j: (i, j)),
                ],
                out_specs=pl.BlockSpec((tile_b, 1), lambda i, j: (i, 0)),
                scratch_shapes=[
                    pltpu.VMEM((tile_b, 128), jnp.float32),  # dot partials
                    pltpu.VMEM((tile_b, 128), jnp.float32),  # |p|^2 partials
                    pltpu.VMEM((tile_b, 128), jnp.float32),  # |t|^2 partials
                ],
            ),
            compiler_params=pltpu.CompilerParams(
                dimension_semantics=("parallel", "arbitrary"),
                vmem_limit_bytes=vmem_limit,
            ),
        )(predictions, targets)

    return jnp.mean(losses[:B, 0])


def _reference(predictions, targets):
    p = predictions.astype(jnp.float32)
    t = targets.astype(jnp.float32)
    dot = jnp.sum(p * t, axis=-1)
    np_ = jnp.sqrt(jnp.sum(p * p, axis=-1) + 1e-8)
    nt_ = jnp.sqrt(jnp.sum(t * t, axis=-1) + 1e-8)
    cos = dot / (np_ * nt_ + 1e-8)
    return jnp.mean(1.0 - cos)


if __name__ == "__main__":
    key = jax.random.PRNGKey(0)
    k1, k2 = jax.random.split(key)

    # Main check: small shapes consistent with the module (batch=16, features=256).
    B, D = 16, 256
    predictions = jax.random.normal(k1, (B, D), dtype=jnp.float32)
    targets = jax.random.normal(k2, (B, D), dtype=jnp.float32)

    loss = cosine_similarity_loss(predictions, targets)
    jax.block_until_ready(loss)
    ref = _reference(predictions, targets)
    assert jnp.allclose(loss, ref, atol=1e-5, rtol=1e-5), (loss, ref)

    # Awkward shape: exercises the zero-pad + slice path (no oversized blocks).
    loss2 = cosine_similarity_loss(predictions[:10, :200], targets[:10, :200])
    jax.block_until_ready(loss2)
    ref2 = _reference(predictions[:10, :200], targets[:10, :200])
    assert jnp.allclose(loss2, ref2, atol=1e-5, rtol=1e-5), (loss2, ref2)

    # bf16 inputs: dtype-aware tiling (16-row granularity), f32 in-kernel accumulation.
    pb16 = predictions.astype(jnp.bfloat16)
    tb16 = targets.astype(jnp.bfloat16)
    loss3 = cosine_similarity_loss(pb16, tb16)
    jax.block_until_ready(loss3)
    ref3 = _reference(pb16, tb16)
    assert jnp.allclose(loss3, ref3, atol=1e-4, rtol=1e-4), (loss3, ref3)

    print("KERNEL_OK")
</pallas_src>

<mosaic_0001>
module attributes {stable_mosaic.version = 11 : i64} {
  func.func @_cos_loss_kernel_single(%arg0: i32, %arg1: memref<8x256xf32, #tpu.memory_space<vmem>>, %arg2: memref<8x256xf32, #tpu.memory_space<vmem>>, %arg3: memref<8x1xf32, #tpu.memory_space<vmem>>) attributes {dimension_semantics = [#tpu.dimension_semantics<parallel>], iteration_bounds = array<i64: 2>, scalar_prefetch = 0 : i64, scratch_operands = 0 : i64, tpu.core_type = #tpu.core_type<tc>, window_params = [{transform_indices = @transform_0, window_bounds = array<i64: 8, 256>}, {transform_indices = @transform_1, window_bounds = array<i64: 8, 256>}, {transform_indices = @transform_2, window_bounds = array<i64: 8, 1>}]} {
    %c0 = arith.constant 0 : index
    %c0_0 = arith.constant 0 : index
    %0 = vector.load %arg1[%c0, %c0_0] : memref<8x256xf32, #tpu.memory_space<vmem>>, vector<8x256xf32>
    %c0_1 = arith.constant 0 : index
    %c0_2 = arith.constant 0 : index
    %1 = vector.load %arg2[%c0_1, %c0_2] : memref<8x256xf32, #tpu.memory_space<vmem>>, vector<8x256xf32>
    %2 = arith.mulf %0, %1 : vector<8x256xf32>
    %cst = arith.constant dense<0.000000e+00> : vector<8xf32>
    %3 = vector.multi_reduction <add>, %2, %cst [1] : vector<8x256xf32> to vector<8xf32>
    %4 = vector.shape_cast %3 : vector<8xf32> to vector<8x1xf32>
    %5 = arith.mulf %0, %0 : vector<8x256xf32>
    %cst_3 = arith.constant dense<0.000000e+00> : vector<8xf32>
    %6 = vector.multi_reduction <add>, %5, %cst_3 [1] : vector<8x256xf32> to vector<8xf32>
    %7 = vector.shape_cast %6 : vector<8xf32> to vector<8x1xf32>
    %8 = arith.mulf %1, %1 : vector<8x256xf32>
    %cst_4 = arith.constant dense<0.000000e+00> : vector<8xf32>
    %9 = vector.multi_reduction <add>, %8, %cst_4 [1] : vector<8x256xf32> to vector<8xf32>
    %10 = vector.shape_cast %9 : vector<8xf32> to vector<8x1xf32>
    %cst_5 = arith.constant 9.99999993E-9 : f32
    %11 = vector.broadcast %cst_5 : f32 to vector<8x1xf32>
    %12 = arith.addf %7, %11 : vector<8x1xf32>
    %13 = math.sqrt %12 : vector<8x1xf32>
    %cst_6 = arith.constant 9.99999993E-9 : f32
    %14 = vector.broadcast %cst_6 : f32 to vector<8x1xf32>
    %15 = arith.addf %10, %14 : vector<8x1xf32>
    %16 = math.sqrt %15 : vector<8x1xf32>
    %17 = arith.mulf %13, %16 : vector<8x1xf32>
    %cst_7 = arith.constant 9.99999993E-9 : f32
    %18 = vector.broadcast %cst_7 : f32 to vector<8x1xf32>
    %19 = arith.addf %17, %18 : vector<8x1xf32>
    %20 = arith.divf %4, %19 : vector<8x1xf32>
    %cst_8 = arith.constant 1.000000e+00 : f32
    %21 = vector.broadcast %cst_8 : f32 to vector<8x1xf32>
    %22 = arith.subf %21, %20 : vector<8x1xf32>
    %c0_9 = arith.constant 0 : index
    %c0_10 = arith.constant 0 : index
    %23 = vector.load %arg3[%c0_9, %c0_10] : memref<8x1xf32, #tpu.memory_space<vmem>>, vector<8x1xf32>
    tpu.vector_store %arg3[%c0_9, %c0_10], %22 {strides = array<i32>} : memref<8x1xf32, #tpu.memory_space<vmem>>, vector<8x1xf32>,
    return
  }
  func.func @transform_0(%arg0: i32) -> (i32, i32) {
    %c0_i32 = arith.constant 0 : i32
    %c0_i32_0 = arith.constant 0 : i32
    return %arg0, %c0_i32 : i32, i32
  }
  func.func @transform_1(%arg0: i32) -> (i32, i32) {
    %c0_i32 = arith.constant 0 : i32
    %c0_i32_0 = arith.constant 0 : i32
    return %arg0, %c0_i32 : i32, i32
  }
  func.func @transform_2(%arg0: i32) -> (i32, i32) {
    %c0_i32 = arith.constant 0 : i32
    %c0_i32_0 = arith.constant 0 : i32
    return %arg0, %c0_i32 : i32, i32
  }
}

</mosaic_0001>

<bundles_post_ra>
// kernel: tpu_custom_call.1
= control target key start
LH: loop header
LB: loop body
LE: loop exit
PB: predicated region body
PF: predicated region fallthrough
CT: control target
= control target key end

     0   :  { %7 = vsyncpa [#allocation3], 0  ;;  %s660_s0 = inlined_call_operand.hbm [shape: f32[16,256], index: 0, kind: input, shape index: {}]   ;;  %s661_s1 = inlined_call_operand.hbm [shape: f32[16,256], index: 1, kind: input, shape index: {}]   ;;  %s662_s2 = inlined_call_operand.vmem [shape: f32[16,1], index: 2, kind: output, shape index: {}]  }
   0x1   :  { %9 = vsyncpa [#allocation3 + $0x1], 0 }
   0x2   :  { %10 = vsyncpa [#allocation5], 0 }
   0x3   :  { %12 = vsyncpa [#allocation5 + $0x1], 0  ;;  %s508_s9 = smov 0   ;;  %s510_s10 = smov 0  }
   0x4   :  { %s512_s11 = smov 0   ;;  %s514_s12 = smov 0  }
   0x5 LB: > { %s527_s13 = sadd.s32 4294967295, %s489_s12   ;;  %s530_s14 = sadd.s32 1, %s489_s12   ;;  %s489_s12 = sphi %s514_s12, %s674_s12   ;;  %s485_s11 = sphi %s512_s11, %s673_s11   ;;  %s481_s10 = sphi %s510_s10, %s672_s10   ;;  %s477_s9 = sphi %s508_s9, %s671_s9  }
   0x6   : > { %s22_s15 = ssub.s32 %s489_s12, %s530_s14  ;;  %s25_s16 = sadd.s32 1, %s485_s11 }
   0x7   : > { %p23_p0 = scmp.eq.s32.totalorder %s22_s15, 0  ;;  %p32_p1 = scmp.ne.s32.totalorder %s485_s11, %s481_s10 }
   0x8   : > { %p33_p2 = scmp.eq.s32.totalorder %s489_s12, 0  ;;  %p38_p3 = scmp.ne.s32.totalorder %s481_s10, %s477_s9 }
   0x9   : > { %s540_s17 = scalar_select %p23_p0, %s485_s11, %s25_s16  }
   0xa   : > { %p34_p4 = por %p33_p2, %p32_p1  ;;  %p39_p5 = scmp.eq.s32.totalorder %s527_s13, 0 }
   0xb   : > { %p356_p6 = scmp.lt.s32.totalorder %s489_s12, 2  ;;  %s549_s19 = sand.u32 1, %s485_s11  }
   0xc   : > { %p544_p7 = por %p39_p5, %p38_p3  ;;  %s331_s20 = sshll.u32 %s549_s19, 4 }
   0xd   : > { %s343_s21 = sshll.u32 %s489_s12, 8  ;;  %s118_s25 = scalar_lea.vmem [#allocation2], %s331_s20 }
   0xe   : > { %s664_s18 = scalar_select %p544_p7, 1, 0 }
   0xf   : > { %s558_s24 = scalar_lea.hbm %s660_s0, %s343_s21  ;;  %s126_s26 = sshll.u32 %s118_s25, 4  ;;  %s562_s26 = int_to_ptr.vmem [resolvable:$true] %s126_s26 }
  0x10   : > { %p564_p8 = pnand %p356_p6, %p34_p4  ;;  %s115_s28 = scalar_lea.sflag [#allocation3], %s549_s19 }
  0x11   : > { %s395_s29 = scalar_lea.hbm %s558_s24, 256  ;;  %s400_s4 = scalar_lea.hbm %s660_s0, 512 }
  0x12   : > { %p396_p11 = scmp.ne.s32.totalorder %s558_s24, %s395_s29  ;;  %p397_p12 = pneg %p564_p8 }
  0x13   : > { %p401_p1 = scmp.lt.s32.totalorder %s558_s24, %s660_s0  ;;  %p402_p2 = scmp.lt.s32.totalorder %s400_s4, %s395_s29 }
  0x14   : > { %p398_p13 = pnand %p397_p12, %p396_p11 }
  0x15   : > { %p403_p3 = por %p402_p2, %p401_p1 }
  0x16   : > { %p399_p0 = pneg %p398_p13 }
  0x18   : > { %p404_p4 = pnand %p403_p3, %p399_p0 }
  0x1a   : > { %407 = shalt.err (!%p404_p4)
}
  0x1b   : > { %s408_s7 = scalar_lea.vmem %s562_s26, 256  ;;  %s491_s8 = smov [#allocation2]  }
  0x1c   : > { %p409_p5 = scmp.ne.s32.totalorder %s562_s26, %s408_s7  ;;  %s413_s9 = sshll.u32 %s491_s8, 4  ;;  %s414_s9 = int_to_ptr.vmem [resolvable:$false] %s413_s9 }
  0x1d   : > { %s415_s15 = scalar_lea.vmem %s414_s9, 512  ;;  %p416_p13 = scmp.lt.s32.totalorder %s562_s26, %s414_s9 }
  0x1e   : > { %p411_p6 = pnand %p409_p5, %p397_p12  ;;  %p417_p9 = scmp.lt.s32.totalorder %s415_s15, %s408_s7 }
  0x20   : > { %p412_p11 = pneg %p411_p6  ;;  %p418_p10 = por %p417_p9, %p416_p13 }
  0x22   : > { %p419_p1 = pnand %p418_p10, %p412_p11 }
  0x24   : > { %422 = shalt.err (!%p419_p1)
}
  0x25   : > { %352 = dma.hbm_to_vmem [thread:$0]  (!%p564_p8), %s558_s24, 256, %s562_s26, %s115_s28  }
  0x26   : > { %p666_p0 = scmp.lt.s32.totalorder %s489_s12, 3  ;;  %p667_p2 = scmp.ge.s32.totalorder %s489_s12, 1 }
  0x27   : > { %s608_s25 = scalar_lea.hbm %s661_s1, %s343_s21  ;;  %s137_s29 = scalar_lea.vmem [#allocation4], %s331_s20 }
  0x28   : > { %p599_p3 = pnand %p667_p2, %p666_p0  ;;  %s145_s30 = sshll.u32 %s137_s29, 4  ;;  %s146_s30 = int_to_ptr.vmem [resolvable:$true] %s145_s30 }
  0x29   : > { %s134_s24 = scalar_lea.sflag [#allocation5], %s549_s19  ;;  %s423_s26 = scalar_lea.hbm %s608_s25, 256 }
  0x2a   : > { %s668_s16 = scalar_select %p599_p3, 1, 0 }
  0x2b   : > { %p424_p9 = scmp.ne.s32.totalorder %s608_s25, %s423_s26  ;;  %s428_s3 = scalar_lea.hbm %s661_s1, 512 }
  0x2c   : > { %p429_p5 = scmp.lt.s32.totalorder %s608_s25, %s661_s1  ;;  %p430_p6 = scmp.lt.s32.totalorder %s428_s3, %s423_s26 }
  0x2d   : > { %p426_p10 = pnand %p424_p9, %p397_p12 }
  0x2e   : > { %p431_p11 = por %p430_p6, %p429_p5 }
  0x2f   : > { %p427_p4 = pneg %p426_p10 }
  0x31   : > { %p432_p13 = pnand %p431_p11, %p427_p4 }
  0x33   : > { %435 = shalt.err (!%p432_p13)
}
  0x34   : > { %s436_s20 = scalar_lea.vmem %s146_s30, 256  ;;  %s492_s19 = smov [#allocation4]  }
  0x35   : > { %p437_p1 = scmp.ne.s32.totalorder %s146_s30, %s436_s20  ;;  %s441_s5 = sshll.u32 %s492_s19, 4  ;;  %s442_s5 = int_to_ptr.vmem [resolvable:$false] %s441_s5 }
  0x36   : > { %s443_s6 = scalar_lea.vmem %s442_s5, 512  ;;  %p444_p9 = scmp.lt.s32.totalorder %s146_s30, %s442_s5 }
  0x37   : > { %p439_p0 = pnand %p437_p1, %p397_p12  ;;  %p445_p10 = scmp.lt.s32.totalorder %s443_s6, %s436_s20 }
  0x39   : > { %p440_p2 = pneg %p439_p0  ;;  %p446_p7 = por %p445_p10, %p444_p9 }
  0x3b   : > { %p447_p3 = pnand %p446_p7, %p440_p2 }
  0x3d   : > { %450 = shalt.err (!%p447_p3)
}
  0x3e   : > { %355 = dma.hbm_to_vmem [thread:$0]  (!%p564_p8), %s608_s25, 256, %s146_s30, %s134_s24  }
  0x3f   : > { %p669_p4 = scmp.ne.s32.totalorder %s668_s16, 0 }
  0x40   : > { %s156_s7 = sand.u32 (!%p669_p4), 1, %s481_s10   ;;  %p670_p12 = scmp.ne.s32.totalorder (!%p669_p4), %s664_s18, 0 }
  0x41   : > { %154 = sbr.rel (%p669_p4) target bundleno = 263 (0x107), region = 28  ;;  %s338_s8 = sshll.u32 (!%p669_p4), %s156_s7, 4 }
  0x42   : > { %s157_s9 = scalar_lea.sflag (!%p669_p4), [#allocation3], %s156_s7  ;;  %s160_s15 = scalar_lea.vmem (!%p669_p4), [#allocation2], %s338_s8 }
  0x46   : > { %468 = dma.done.wait (%p670_p12), %s157_s9, 256  }
  0x47   : > { %470 = vsyncadd (%p670_p12), %s157_s9, 4294967040  ;;  %s166_s22 = scalar_lea.sflag [#allocation5], %s156_s7  ;;  %s169_s23 = scalar_lea.vmem [#allocation4], %s338_s8 }
  0x48   : > { %472 = dma.done.wait (%p670_p12), %s166_s22, 256  }
  0x49   : > { %474 = vsyncadd (%p670_p12), %s166_s22, 4294967040  ;;  %v198_v0 = vld [vmem:[%s160_s15] sm:$0xff]  ;;  %v199_v1 = vld [vmem:[%s160_s15 + $0x8] sm:$0xff]  ;;  %p194_p7 = scmp.lt.s32.totalorder %s527_s13, 1  ;;  %vm238_vm4 = vcmask 7168  }
  0x4a   : > { %v200_v2 = vld [vmem:[%s169_s23] sm:$0xff]  ;;  %v207_v3 = vmul.f32 %v198_v0, %v198_v0  ;;  %v208_v4 = vmul.f32 %v199_v1, %v199_v1  ;;  %v201_v5 = vld [vmem:[%s169_s23 + $0x8] sm:$0xff] }
  0x4b   : > { %v212_v6 = vmul.f32 %v200_v2, %v200_v2  ;;  %v202_v7 = vmul.f32 %v200_v2, %v198_v0  ;;  %v213_v8 = vmul.f32 %v201_v5, %v201_v5  ;;  %v203_v9 = vmul.f32 %v201_v5, %v199_v1  ;;  %s676_s13 = smov (!%p194_p7, %s527_s13), 1 }
  0x4c   : > { %v209_v10 = vadd.f32 %v208_v4, %v207_v3  ;;  %s340_s18 = sshll.u32 %s676_s13, 3 }
  0x4d   : > { %v204_v11 = vadd.f32 %v203_v9, %v202_v7  ;;  %v214_v12 = vadd.f32 %v213_v8, %v212_v6  ;;  %s197_s25 = scalar_lea.vmem %s662_s2, %s340_s18 }
  0x4e   : > { %210 = vadd.xlane.f32.xlu0 %v209_v10 }
  0x4f   : > { %205 = vadd.xlane.f32.xlu1 %v204_v11 }
  0x52   : > { %215 = vadd.xlane.f32.xlu0 %v214_v12 }
  0xd7   : > { %v211_v13 = vpop.xlane.xlu0 %210 }
  0xd8   : > { %v217_v14 = vadd.f32 1e-08, %v211_v13  ;;  %v206_v29 = vpop.xlane.xlu1 %205 }
  0xda   : > { %389 = vrsqrt.f32 %v217_v14  ;;  %vm220_vm0 = vcmp.eq.f32.partialorder %v217_v14, inf  ;;  %v223_v22 = vand.u32 2147483648, %v217_v14  ;;  %vm222_vm2 = vcmp.eq.f32.partialorder %v217_v14, 0.0 }
  0xdb   : > { %v216_v15 = vpop.xlane.xlu0 %215 }
  0xdc   : > { %v225_v16 = vadd.f32 1e-08, %v216_v15 }
  0xde   : > { %391 = vrsqrt.f32 %v225_v16  ;;  %vm228_vm1 = vcmp.eq.f32.partialorder %v225_v16, inf  ;;  %v231_v23 = vand.u32 2147483648, %v225_v16  ;;  %vm230_vm3 = vcmp.eq.f32.partialorder %v225_v16, 0.0 }
  0xe7   : > { %v390_v17 = vpop.eup %389 }
  0xe8   : > { %v219_v18 = vmul.f32 %v390_v17, %v217_v14 }
  0xea   : > { %v221_v20 = vsel %vm220_vm0, %v217_v14, %v219_v18 }
  0xeb   : > { %v392_v19 = vpop.eup %391  ;;  %v224_v25 = vsel %vm222_vm2, %v223_v22, %v221_v20 }
  0xec   : > { %v227_v21 = vmul.f32 %v392_v19, %v225_v16 }
  0xee   : > { %v229_v24 = vsel %vm228_vm1, %v225_v16, %v227_v21 }
  0xef   : > { %v232_v26 = vsel %vm230_vm3, %v231_v23, %v229_v24 }
  0xf0   : > { %v233_v27 = vmul.f32 %v232_v26, %v224_v25 }
  0xf2   : > { %v234_v28 = vadd.f32 1e-08, %v233_v27 }
  0xf4   : > { %393 = vrcp.f32 %v234_v28 }
 0x101   : > { %v394_v30 = vpop.eup %393 }
 0x102   : > { %v236_v31 = vmul.f32 %v394_v30, %v206_v29 }
 0x104   : > { %v237_v32 = vsub.f32 1.0, %v236_v31 }
 0x106   : > { %239 = vst.msk [vmem:[%s197_s25] sm:$0xff] %vm238_vm4, %v237_v32 }
 0x107 PF: > { %p15_p8 = scmp.ge.s32.totalorder %s530_s14, 4   ;;  %s671_s9 = smov %s481_s10 }
 0x108   : > { %s672_s10 = smov %s485_s11  ;;  %s673_s11 = smov %s540_s17 }
 0x109   : > { %s674_s12 = smov %s530_s14  ;;  %17 = sbr.rel (!%p15_p8) target bundleno = 5 (0x5), region = 81 }
 0x10e   :  { %259 = vsyncpa [#allocation3], 1 }
 0x10f   :  { %261 = vsyncpa [#allocation3 + $0x1], 1 }
 0x110   :  { %262 = vsyncpa [#allocation5], 1 }
 0x111   :  { %264 = vsyncpa [#allocation5 + $0x1], 1 }

</bundles_post_ra>
